<compile_context>
chip_gen: v7x
topology: tpu7x:2x2x1
jax: 0.10.0
libtpu: 0.0.40
codegen_flags: <defaults>
</compile_context>

<pallas_src>
import functools

import jax
import jax.numpy as jnp
from jax.experimental import pallas as pl
from jax.experimental.pallas import tpu as pltpu


_VMEM_LIMIT = 32 * 1024 * 1024  # explicit scoped-VMEM budget (safe on v7x's 64 MiB)


# ----------------------------- Pallas kernels -----------------------------

def _qkv_kernel(x_ref, wq_ref, wk_ref, wv_ref, bq_ref, bk_ref, bv_ref,
                q_ref, k_ref, v_ref):
    """Fused Q/K/V projection: x tile read once, three MXU matmuls."""
    x = x_ref[...]                                              # (tm, F) bf16

    def proj(w_ref, b_ref, o_ref):
        acc = jnp.dot(x, w_ref[...], preferred_element_type=jnp.float32)
        o_ref[...] = (acc + b_ref[...]).astype(o_ref.dtype)     # bias in f32

    proj(wq_ref, bq_ref, q_ref)
    proj(wk_ref, bk_ref, k_ref)
    proj(wv_ref, bv_ref, v_ref)


def _linear_kernel(x_ref, w_ref, b_ref, o_ref):
    # x: (tm, K) bf16, w: (K, N) bf16, b: (1, N) f32 -> o: (tm, N)
    acc = jnp.dot(x_ref[...], w_ref[...], preferred_element_type=jnp.float32)
    o_ref[...] = (acc + b_ref[...]).astype(o_ref.dtype)


def _attention_kernel(q_ref, k_ref, v_ref, o_ref, *, scale):
    # q/k/v blocks: (Bt, S, D) bf16.  Scores/softmax in f32; MXU inputs bf16.
    q = q_ref[...]
    k = k_ref[...]
    v = v_ref[...]
    # Contract last dims of both operands directly (no explicit .T -> no XLU).
    s = jnp.einsum("bqd,bkd->bqk", q, k,
                   preferred_element_type=jnp.float32) * scale   # (Bt,S,S) f32
    s = s - jnp.max(s, axis=-1, keepdims=True)
    p = jnp.exp(s)
    denom = jnp.sum(p, axis=-1, keepdims=True)
    p = p * pl.reciprocal(denom, approx=True)                    # EUP vrcp
    # TODO(synk): for long sequences, restructure as a flash-style KV-tiled
    # loop (online-softmax m/l/acc in VMEM scratch) instead of the full (S,S)
    # score matrix; unnecessary at ViT-block sequence lengths.
    o_ref[...] = jnp.einsum("bqk,bkd->bqd", p.astype(jnp.bfloat16), v,
                            preferred_element_type=jnp.float32
                            ).astype(o_ref.dtype)                # (Bt,S,D)


# ------------------------------ wrappers -----------------------------------

def pallas_qkv_projection(x2d, wq, wk, wv, bq, bk, bv, *, tile_m=512):
    """x2d: (M, F) -> (q, k, v), each (M, F) bf16, y = x @ W + b."""
    M, F = x2d.shape
    assert wq.shape == (F, F) and wk.shape == (F, F) and wv.shape == (F, F)

    tm = M if M <= tile_m else tile_m               # (8,128)-safe: full or 512
    grid = (pl.cdiv(M, tm),)

    x_spec = pl.BlockSpec((tm, F), lambda i: (i, 0))
    w_spec = pl.BlockSpec((F, F), lambda i: (0, 0))  # weights resident across grid
    b_spec = pl.BlockSpec((1, F), lambda i: (0, 0))  # biases resident across grid
    o_spec = pl.BlockSpec((tm, F), lambda i: (i, 0))
    o_shape = jax.ShapeDtypeStruct((M, F), jnp.bfloat16)

    return pl.pallas_call(
        _qkv_kernel,
        out_shape=(o_shape, o_shape, o_shape),
        grid=grid,
        in_specs=[x_spec, w_spec, w_spec, w_spec, b_spec, b_spec, b_spec],
        out_specs=(o_spec, o_spec, o_spec),
        compiler_params=pltpu.CompilerParams(
            dimension_semantics=("parallel",),
            vmem_limit_bytes=_VMEM_LIMIT,
        ),
    )(x2d.astype(jnp.bfloat16),
      wq.astype(jnp.bfloat16), wk.astype(jnp.bfloat16), wv.astype(jnp.bfloat16),
      bq.reshape(1, F).astype(jnp.float32),
      bk.reshape(1, F).astype(jnp.float32),
      bv.reshape(1, F).astype(jnp.float32))


def pallas_linear(x2d, w, b, *, out_dtype=jnp.float32, tile_m=512):
    """x2d: (M, K), w: (K, N), b: (N,) -> (M, N), y = x @ W + b."""
    M, K = x2d.shape
    Kw, N = w.shape
    assert K == Kw

    tm = M if M <= tile_m else tile_m               # (8,128)-safe: full or 512
    grid = (pl.cdiv(M, tm),)
    return pl.pallas_call(
        _linear_kernel,
        out_shape=jax.ShapeDtypeStruct((M, N), out_dtype),
        grid=grid,
        in_specs=[
            pl.BlockSpec((tm, K), lambda i: (i, 0)),
            pl.BlockSpec((K, N), lambda i: (0, 0)),   # weight resident across grid
            pl.BlockSpec((1, N), lambda i: (0, 0)),   # bias resident across grid
        ],
        out_specs=pl.BlockSpec((tm, N), lambda i: (i, 0)),
        compiler_params=pltpu.CompilerParams(
            dimension_semantics=("parallel",),
            vmem_limit_bytes=_VMEM_LIMIT,
        ),
    )(x2d.astype(jnp.bfloat16), w.astype(jnp.bfloat16),
      b.reshape(1, N).astype(jnp.float32))


def pallas_attention(q, k, v, head_dim, *, max_batch_per_step=16):
    """q/k/v: (B, S, D) bf16 -> (B, S, D) bf16, softmax(QK^T/sqrt(head_dim)) V."""
    B, S, D = q.shape
    scale = 1.0 / (head_dim ** 0.5)

    # Process a block of "heads" per grid step: largest divisor of B <= cap.
    bt = 1
    for c in range(1, min(B, max_batch_per_step) + 1):
        if B % c == 0:
            bt = c

    kernel = functools.partial(_attention_kernel, scale=scale)
    in_spec = pl.BlockSpec((bt, S, D), lambda i: (i, 0, 0))
    return pl.pallas_call(
        kernel,
        out_shape=jax.ShapeDtypeStruct((B, S, D), jnp.bfloat16),
        grid=(B // bt,),
        in_specs=[in_spec, in_spec, in_spec],
        out_specs=pl.BlockSpec((bt, S, D), lambda i: (i, 0, 0)),
        compiler_params=pltpu.CompilerParams(
            dimension_semantics=("parallel",),
            vmem_limit_bytes=_VMEM_LIMIT,
        ),
    )(q.astype(jnp.bfloat16), k.astype(jnp.bfloat16), v.astype(jnp.bfloat16))


def multi_head_attention(x, params, num_heads):
    """Forward pass matching the PyTorch MultiHeadAttention module.

    x: (t, batch, seq_len, in_features) float32.
    """
    t, b, s, f = x.shape
    d = f // num_heads
    x2d = x.reshape(t * b * s, f)

    # Fused Q/K/V projection: single pallas_call, x read from HBM once,
    # q/k/v emitted as separate contiguous arrays (no slice copies below).
    q, k, v = pallas_qkv_projection(
        x2d, params["wq"], params["wk"], params["wv"],
        params["bq"], params["bk"], params["bv"])

    # Exact replica of the PyTorch .view semantics: a raw row-major reshape of
    # a contiguous (M, F) array -> metadata-only, no HBM traffic.
    q = q.reshape(t * b * num_heads, s, d)
    k = k.reshape(t * b * num_heads, s, d)
    v = v.reshape(t * b * num_heads, s, d)

    attn = pallas_attention(q, k, v, d)               # (t*b*h, s, d) bf16
    attn = attn.reshape(t * b * s, f)                 # free reshape

    out = pallas_linear(attn, params["wo"], params["bo"], out_dtype=jnp.float32)
    return out.reshape(t, b, s, f)


# ----------------------------- reference (check) ----------------------------

def _reference(x, params, num_heads):
    t, b, s, f = x.shape
    d = f // num_heads
    x2d = x.reshape(t * b * s, f)
    q = (x2d @ params["wq"] + params["bq"]).reshape(t * b * num_heads, s, d)
    k = (x2d @ params["wk"] + params["bk"]).reshape(t * b * num_heads, s, d)
    v = (x2d @ params["wv"] + params["bv"]).reshape(t * b * num_heads, s, d)
    scores = jnp.einsum("bij,bkj->bik", q, k) / (d ** 0.5)
    w = jax.nn.softmax(scores, axis=-1)
    a = jnp.einsum("bik,bkd->bid", w, v).reshape(t * b * s, f)
    return (a @ params["wo"] + params["bo"]).reshape(t, b, s, f)


# --------------------------------- main -------------------------------------

if __name__ == "__main__":
    t, batch, seq_len, in_features, num_heads = 2, 2, 8, 32, 4

    key = jax.random.PRNGKey(0)
    kx, kq, kk, kv, ko, kbq, kbk, kbv, kbo = jax.random.split(key, 9)

    w_scale = 1.0 / (in_features ** 0.5)
    params = {
        "wq": jax.random.normal(kq, (in_features, in_features), jnp.float32) * w_scale,
        "wk": jax.random.normal(kk, (in_features, in_features), jnp.float32) * w_scale,
        "wv": jax.random.normal(kv, (in_features, in_features), jnp.float32) * w_scale,
        "wo": jax.random.normal(ko, (in_features, in_features), jnp.float32) * w_scale,
        "bq": jax.random.normal(kbq, (in_features,), jnp.float32) * 0.01,
        "bk": jax.random.normal(kbk, (in_features,), jnp.float32) * 0.01,
        "bv": jax.random.normal(kbv, (in_features,), jnp.float32) * 0.01,
        "bo": jax.random.normal(kbo, (in_features,), jnp.float32) * 0.01,
    }

    x = jax.random.normal(kx, (t, batch, seq_len, in_features), jnp.float32)

    out = multi_head_attention(x, params, num_heads)
    out = jax.block_until_ready(out)

    ref = _reference(x, params, num_heads)
    assert out.shape == (t, batch, seq_len, in_features)
    # bf16 MXU operands / bf16 intermediates + approx reciprocal -> loosen
    # tolerance vs the f32 reference.
    assert jnp.allclose(out, ref, atol=7.5e-2, rtol=5e-2), "mismatch vs reference"

    print("KERNEL_OK")
</pallas_src>

<mosaic_0001>
module attributes {stable_mosaic.version = 11 : i64} {
  func.func @_qkv_kernel(%arg0: i32, %arg1: memref<32x32xbf16, #tpu.memory_space<vmem>>, %arg2: memref<32x32xbf16, #tpu.memory_space<vmem>>, %arg3: memref<32x32xbf16, #tpu.memory_space<vmem>>, %arg4: memref<32x32xbf16, #tpu.memory_space<vmem>>, %arg5: memref<1x32xf32, #tpu.memory_space<vmem>>, %arg6: memref<1x32xf32, #tpu.memory_space<vmem>>, %arg7: memref<1x32xf32, #tpu.memory_space<vmem>>, %arg8: memref<32x32xbf16, #tpu.memory_space<vmem>>, %arg9: memref<32x32xbf16, #tpu.memory_space<vmem>>, %arg10: memref<32x32xbf16, #tpu.memory_space<vmem>>) attributes {dimension_semantics = [#tpu.dimension_semantics<parallel>], iteration_bounds = array<i64: 1>, scalar_prefetch = 0 : i64, scratch_operands = 0 : i64, tpu.core_type = #tpu.core_type<tc>, window_params = [{transform_indices = @transform_0, window_bounds = array<i64: 32, 32>}, {pipeline_mode = #tpu.pipeline_mode<synchronous>, transform_indices = @transform_1, window_bounds = array<i64: 32, 32>}, {pipeline_mode = #tpu.pipeline_mode<synchronous>, transform_indices = @transform_2, window_bounds = array<i64: 32, 32>}, {pipeline_mode = #tpu.pipeline_mode<synchronous>, transform_indices = @transform_3, window_bounds = array<i64: 32, 32>}, {pipeline_mode = #tpu.pipeline_mode<synchronous>, transform_indices = @transform_4, window_bounds = array<i64: 1, 32>}, {pipeline_mode = #tpu.pipeline_mode<synchronous>, transform_indices = @transform_5, window_bounds = array<i64: 1, 32>}, {pipeline_mode = #tpu.pipeline_mode<synchronous>, transform_indices = @transform_6, window_bounds = array<i64: 1, 32>}, {transform_indices = @transform_7, window_bounds = array<i64: 32, 32>}, {transform_indices = @transform_8, window_bounds = array<i64: 32, 32>}, {transform_indices = @transform_9, window_bounds = array<i64: 32, 32>}]} {
    %c0 = arith.constant 0 : index
    %c0_0 = arith.constant 0 : index
    %0 = vector.load %arg1[%c0, %c0_0] : memref<32x32xbf16, #tpu.memory_space<vmem>>, vector<32x32xbf16>
    %c0_1 = arith.constant 0 : index
    %c0_2 = arith.constant 0 : index
    %1 = vector.load %arg2[%c0_1, %c0_2] : memref<32x32xbf16, #tpu.memory_space<vmem>>, vector<32x32xbf16>
    %cst = arith.constant dense<0.000000e+00> : vector<32x32xf32>
    %2 = tpu.matmul %0, %1, %cst {dimension_numbers = #tpu.dot_dimension_numbers<[1], [0], [0], [1], [0, 0, 1, 1], [], []>} : vector<32x32xbf16>, vector<32x32xbf16>, vector<32x32xf32> -> vector<32x32xf32>
    %c0_3 = arith.constant 0 : index
    %c0_4 = arith.constant 0 : index
    %3 = vector.load %arg5[%c0_3, %c0_4] : memref<1x32xf32, #tpu.memory_space<vmem>>, vector<1x32xf32>
    %4 = vector.broadcast %3 : vector<1x32xf32> to vector<32x32xf32>
    %5 = arith.addf %2, %4 : vector<32x32xf32>
    %6 = arith.truncf %5 : vector<32x32xf32> to vector<32x32xbf16>
    %c0_5 = arith.constant 0 : index
    %c0_6 = arith.constant 0 : index
    %7 = vector.load %arg8[%c0_5, %c0_6] : memref<32x32xbf16, #tpu.memory_space<vmem>>, vector<32x32xbf16>
    tpu.vector_store %arg8[%c0_5, %c0_6], %6 {strides = array<i32>} : memref<32x32xbf16, #tpu.memory_space<vmem>>, vector<32x32xbf16>,
    %c0_7 = arith.constant 0 : index
    %c0_8 = arith.constant 0 : index
    %8 = vector.load %arg3[%c0_7, %c0_8] : memref<32x32xbf16, #tpu.memory_space<vmem>>, vector<32x32xbf16>
    %cst_9 = arith.constant dense<0.000000e+00> : vector<32x32xf32>
    %9 = tpu.matmul %0, %8, %cst_9 {dimension_numbers = #tpu.dot_dimension_numbers<[1], [0], [0], [1], [0, 0, 1, 1], [], []>} : vector<32x32xbf16>, vector<32x32xbf16>, vector<32x32xf32> -> vector<32x32xf32>
    %c0_10 = arith.constant 0 : index
    %c0_11 = arith.constant 0 : index
    %10 = vector.load %arg6[%c0_10, %c0_11] : memref<1x32xf32, #tpu.memory_space<vmem>>, vector<1x32xf32>
    %11 = vector.broadcast %10 : vector<1x32xf32> to vector<32x32xf32>
    %12 = arith.addf %9, %11 : vector<32x32xf32>
    %13 = arith.truncf %12 : vector<32x32xf32> to vector<32x32xbf16>
    %c0_12 = arith.constant 0 : index
    %c0_13 = arith.constant 0 : index
    %14 = vector.load %arg9[%c0_12, %c0_13] : memref<32x32xbf16, #tpu.memory_space<vmem>>, vector<32x32xbf16>
    tpu.vector_store %arg9[%c0_12, %c0_13], %13 {strides = array<i32>} : memref<32x32xbf16, #tpu.memory_space<vmem>>, vector<32x32xbf16>,
    %c0_14 = arith.constant 0 : index
    %c0_15 = arith.constant 0 : index
    %15 = vector.load %arg4[%c0_14, %c0_15] : memref<32x32xbf16, #tpu.memory_space<vmem>>, vector<32x32xbf16>
    %cst_16 = arith.constant dense<0.000000e+00> : vector<32x32xf32>
    %16 = tpu.matmul %0, %15, %cst_16 {dimension_numbers = #tpu.dot_dimension_numbers<[1], [0], [0], [1], [0, 0, 1, 1], [], []>} : vector<32x32xbf16>, vector<32x32xbf16>, vector<32x32xf32> -> vector<32x32xf32>
    %c0_17 = arith.constant 0 : index
    %c0_18 = arith.constant 0 : index
    %17 = vector.load %arg7[%c0_17, %c0_18] : memref<1x32xf32, #tpu.memory_space<vmem>>, vector<1x32xf32>
    %18 = vector.broadcast %17 : vector<1x32xf32> to vector<32x32xf32>
    %19 = arith.addf %16, %18 : vector<32x32xf32>
    %20 = arith.truncf %19 : vector<32x32xf32> to vector<32x32xbf16>
    %c0_19 = arith.constant 0 : index
    %c0_20 = arith.constant 0 : index
    %21 = vector.load %arg10[%c0_19, %c0_20] : memref<32x32xbf16, #tpu.memory_space<vmem>>, vector<32x32xbf16>
    tpu.vector_store %arg10[%c0_19, %c0_20], %20 {strides = array<i32>} : memref<32x32xbf16, #tpu.memory_space<vmem>>, vector<32x32xbf16>,
    return
  }
  func.func @transform_0(%arg0: i32) -> (i32, i32) {
    %c0_i32 = arith.constant 0 : i32
    %c0_i32_0 = arith.constant 0 : i32
    return %arg0, %c0_i32 : i32, i32
  }
  func.func @transform_1(%arg0: i32) -> (i32, i32) {
    %c0_i32 = arith.constant 0 : i32
    %c0_i32_0 = arith.constant 0 : i32
    %c0_i32_1 = arith.constant 0 : i32
    return %c0_i32, %c0_i32_0 : i32, i32
  }
  func.func @transform_2(%arg0: i32) -> (i32, i32) {
    %c0_i32 = arith.constant 0 : i32
    %c0_i32_0 = arith.constant 0 : i32
    %c0_i32_1 = arith.constant 0 : i32
    return %c0_i32, %c0_i32_0 : i32, i32
  }
  func.func @transform_3(%arg0: i32) -> (i32, i32) {
    %c0_i32 = arith.constant 0 : i32
    %c0_i32_0 = arith.constant 0 : i32
    %c0_i32_1 = arith.constant 0 : i32
    return %c0_i32, %c0_i32_0 : i32, i32
  }
  func.func @transform_4(%arg0: i32) -> (i32, i32) {
    %c0_i32 = arith.constant 0 : i32
    %c0_i32_0 = arith.constant 0 : i32
    %c0_i32_1 = arith.constant 0 : i32
    return %c0_i32, %c0_i32_0 : i32, i32
  }
  func.func @transform_5(%arg0: i32) -> (i32, i32) {
    %c0_i32 = arith.constant 0 : i32
    %c0_i32_0 = arith.constant 0 : i32
    %c0_i32_1 = arith.constant 0 : i32
    return %c0_i32, %c0_i32_0 : i32, i32
  }
  func.func @transform_6(%arg0: i32) -> (i32, i32) {
    %c0_i32 = arith.constant 0 : i32
    %c0_i32_0 = arith.constant 0 : i32
    %c0_i32_1 = arith.constant 0 : i32
    return %c0_i32, %c0_i32_0 : i32, i32
  }
  func.func @transform_7(%arg0: i32) -> (i32, i32) {
    %c0_i32 = arith.constant 0 : i32
    %c0_i32_0 = arith.constant 0 : i32
    return %arg0, %c0_i32 : i32, i32
  }
  func.func @transform_8(%arg0: i32) -> (i32, i32) {
    %c0_i32 = arith.constant 0 : i32
    %c0_i32_0 = arith.constant 0 : i32
    return %arg0, %c0_i32 : i32, i32
  }
  func.func @transform_9(%arg0: i32) -> (i32, i32) {
    %c0_i32 = arith.constant 0 : i32
    %c0_i32_0 = arith.constant 0 : i32
    return %arg0, %c0_i32 : i32, i32
  }
}

</mosaic_0001>

<bundles_post_ra>
// kernel: tpu_custom_call.1
= control target key start
LH: loop header
LB: loop body
LE: loop exit
PB: predicated region body
PF: predicated region fallthrough
CT: control target
= control target key end

     0   :  { %15 = vsyncpa [#allocation3], 0  ;;  %s905_s0 = inlined_call_operand.hbm [shape: bf16[32,32], index: 0, kind: input, shape index: {}]   ;;  %s906_s1 = inlined_call_operand.hbm [shape: bf16[32,32], index: 1, kind: input, shape index: {}]   ;;  %s907_s2 = inlined_call_operand.hbm [shape: bf16[32,32], index: 2, kind: input, shape index: {}]   ;;  %s908_s3 = inlined_call_operand.hbm [shape: bf16[32,32], index: 3, kind: input, shape index: {}]   ;;  %s909_s4 = inlined_call_operand.vmem [shape: f32[1,32], index: 4, kind: input, shape index: {}]   ;;  %s910_s5 = inlined_call_operand.vmem [shape: f32[1,32], index: 5, kind: input, shape index: {}]   ;;  %s911_s6 = inlined_call_operand.vmem [shape: f32[1,32], index: 6, kind: input, shape index: {}]   ;;  %s912_s7 = inlined_call_operand.hbm [shape: bf16[32,32], index: 7, kind: output, shape index: {0}]   ;;  %s913_s8 = inlined_call_operand.hbm [shape: bf16[32,32], index: 8, kind: output, shape index: {1}]   ;;  %s914_s9 = inlined_call_operand.hbm [shape: bf16[32,32], index: 9, kind: output, shape index: {2}]  }
   0x1   :  { %16 = vsyncpa [#allocation6], 0 }
   0x2   :  { %17 = vsyncpa [#allocation9], 0 }
   0x3   :  { %18 = vsyncpa [#allocation4], 0 }
   0x4   :  { %19 = vsyncpa [#allocation12], 0  ;;  %s693_s30 = smov [#allocation5]   ;;  %s694_s11 = smov [#allocation2]  }
   0x5   :  { %s37_s10 = sshll.u32 %s693_s30, 4  ;;  %s25_s12 = sshll.u32 %s694_s11, 4  ;;  %s38_s10 = int_to_ptr.vmem [resolvable:$true] %s37_s10  ;;  %s752_s12 = int_to_ptr.vmem [resolvable:$true] %s25_s12 }
   0x6   :  { %s529_s15 = scalar_lea.hbm %s906_s1, 256 }
   0x7   :  { %p530_p0 = scmp.ne.s32.totalorder %s906_s1, %s529_s15  ;;  %p533_p1 = scmp.lt.u32.totalorder %s529_s15, %s906_s1 }
   0x9   :  { %p535_p2 = pnand %p533_p1, %p530_p0 }
   0xb   :  { %538 = shalt.err (!%p535_p2)
}
   0xc   :  { %s539_s20 = scalar_lea.vmem %s38_s10, 256  ;;  %p544_p4 = scmp.lt.s32.totalorder %s38_s10, %s38_s10 }
   0xd   :  { %p540_p3 = scmp.ne.s32.totalorder %s38_s10, %s539_s20  ;;  %p545_p5 = scmp.lt.s32.totalorder %s539_s20, %s539_s20 }
   0xf   :  { %p546_p6 = por %p545_p5, %p544_p4 }
  0x11   :  { %p547_p7 = pnand %p546_p6, %p540_p3 }
  0x13   :  { %550 = shalt.err (!%p547_p7)
}
  0x14   :  { %s695_s21 = smov 64   ;;  %s696_s22 = smov 4  }
  0x15   :  { %43 = dma.hbm_to_vmem [thread:$0]  %s906_s1, 256, %s38_s10, [#allocation6], %s695_s21, %s695_s21, %s696_s22  }
  0x16   :  { %s551_s27 = scalar_lea.hbm %s905_s0, 256 }
  0x17   :  { %p552_p8 = scmp.ne.s32.totalorder %s905_s0, %s551_s27  ;;  %p555_p9 = scmp.lt.u32.totalorder %s551_s27, %s905_s0 }
  0x19   :  { %p557_p10 = pnand %p555_p9, %p552_p8 }
  0x1b   :  { %560 = shalt.err (!%p557_p10)
}
  0x1c   :  { %s561_s13 = scalar_lea.vmem %s752_s12, 256  ;;  %p566_p12 = scmp.lt.s32.totalorder %s752_s12, %s752_s12 }
  0x1d   :  { %p562_p11 = scmp.ne.s32.totalorder %s752_s12, %s561_s13  ;;  %p567_p13 = scmp.lt.s32.totalorder %s561_s13, %s561_s13 }
  0x1f   :  { %p568_p0 = por %p567_p13, %p566_p12 }
  0x21   :  { %p569_p1 = pnand %p568_p0, %p562_p11 }
  0x23   :  { %572 = shalt.err (!%p569_p1)
}
  0x24   :  { %31 = dma.hbm_to_vmem [thread:$0]  %s905_s0, 256, %s752_s12, [#allocation3], %s695_s21, %s695_s21, %s696_s22  }
  0x25   :  { %s697_s14 = smov [#allocation7]   ;;  %s698_s16 = smov [#allocation8]  }
  0x26   :  { %s49_s15 = sshll.u32 %s697_s14, 4  ;;  %s61_s17 = sshll.u32 %s698_s16, 4  ;;  %s50_s15 = int_to_ptr.vmem [resolvable:$true] %s49_s15  ;;  %s789_s17 = int_to_ptr.vmem [resolvable:$true] %s61_s17 }
  0x27   :  { %s573_s20 = scalar_lea.hbm %s907_s2, 256 }
  0x28   :  { %p574_p2 = scmp.ne.s32.totalorder %s907_s2, %s573_s20  ;;  %p577_p3 = scmp.lt.u32.totalorder %s573_s20, %s907_s2 }
  0x2a   :  { %p579_p4 = pnand %p577_p3, %p574_p2 }
  0x2c   :  { %582 = shalt.err (!%p579_p4)
}
  0x2d   :  { %s583_s0 = scalar_lea.vmem %s50_s15, 256  ;;  %p588_p6 = scmp.lt.s32.totalorder %s50_s15, %s50_s15 }
  0x2e   :  { %p584_p5 = scmp.ne.s32.totalorder %s50_s15, %s583_s0  ;;  %p589_p7 = scmp.lt.s32.totalorder %s583_s0, %s583_s0 }
  0x30   :  { %p590_p8 = por %p589_p7, %p588_p6 }
  0x32   :  { %p591_p9 = pnand %p590_p8, %p584_p5 }
  0x34   :  { %594 = shalt.err (!%p591_p9)
}
  0x35   :  { %55 = dma.hbm_to_vmem [thread:$0]  %s907_s2, 256, %s50_s15, [#allocation6], %s695_s21, %s695_s21, %s696_s22  }
  0x36   :  { %s595_s30 = scalar_lea.hbm %s908_s3, 256 }
  0x37   :  { %p596_p10 = scmp.ne.s32.totalorder %s908_s3, %s595_s30  ;;  %p599_p11 = scmp.lt.u32.totalorder %s595_s30, %s908_s3 }
  0x39   :  { %p601_p12 = pnand %p599_p11, %p596_p10 }
  0x3b   :  { %604 = shalt.err (!%p601_p12)
}
  0x3c   :  { %s605_s14 = scalar_lea.vmem %s789_s17, 256  ;;  %p610_p0 = scmp.lt.s32.totalorder %s789_s17, %s789_s17 }
  0x3d   :  { %p606_p13 = scmp.ne.s32.totalorder %s789_s17, %s605_s14  ;;  %p611_p1 = scmp.lt.s32.totalorder %s605_s14, %s605_s14 }
  0x3f   :  { %p612_p2 = por %p611_p1, %p610_p0 }
  0x41   :  { %p613_p3 = pnand %p612_p2, %p606_p13 }
  0x43   :  { %616 = shalt.err (!%p613_p3)
}
  0x44   :  { %67 = dma.hbm_to_vmem [thread:$0]  %s908_s3, 256, %s789_s17, [#allocation9], %s695_s21, %s695_s21, %s696_s22  }
  0x45   :  { %683 = dma.done.wait [#allocation3], 256  }
  0x46   :  { %684 = vsyncadd [#allocation3], 4294967040 }
  0x47   :  { %685 = dma.done.wait [#allocation6], 512  }
  0x48   :  { %686 = vsyncadd [#allocation6], 4294966784 }
  0x49   :  { %687 = dma.done.wait [#allocation9], 256  }
  0x4a   :  { %688 = vsyncadd [#allocation9], 4294967040  ;;  %v521_v0 = vld [vmem:[#allocation5] sm:$0xff]   ;;  %v522_v1 = vld [vmem:[#allocation5 + $0x8] sm:$0xff]   ;;  %vm124_vm0 = vcmask 261120   ;;  %vm196_vm1 = vcmask 257024  }
  0x4b   :  { %488 = vmatprep.subr.bf16.mxu0 %v521_v0  ;;  %v523_v2 = vld [vmem:[#allocation7] sm:$0xff]   ;;  %v525_v4 = vld [vmem:[#allocation2 + $0x8] sm:$0xff]   ;;  %v526_v5 = vld [vmem:[#allocation8] sm:$0xff]   ;;  %s699_s19 = smov [#allocation10]  }
  0x4c   :  { %489 = vmatpush3.bf16.msra.mxu0 %v521_v0  ;;  %v524_v3 = vld [vmem:[#allocation2] sm:$0xff]   ;;  %496 = vmatprep.subr.bf16.mxu1 %v523_v2  ;;  %v527_v6 = vld [vmem:[#allocation7 + $0x8] sm:$0xff]   ;;  %v528_v7 = vld [vmem:[#allocation8 + $0x8] sm:$0xff]   ;;  %s390_s20 = sshll.u32 %s699_s19, 4  ;;  %s391_s20 = int_to_ptr.vmem [resolvable:$true] %s390_s20 }
  0x4d   :  { %490 = vmatprep.subr.bf16.mxu0 %v522_v1  ;;  %497 = vmatpush3.bf16.msra.mxu1 %v523_v2  ;;  %v435_v8 = vld [vmem:[%s909_s4] ss:$0 sm:$0xff]  ;;  %s700_s4 = smov [#allocation11]   ;;  %s617_s25 = scalar_lea.vmem %s391_s20, 256 }
  0x4e   :  { %492 = vmatprep.mubr.msk.bf16.mxu0 %vm124_vm0, %v524_v3  ;;  %500 = vmatprep.mubr.msk.bf16.mxu1 %vm124_vm0, %v524_v3  ;;  %v446_v10 = vld [vmem:[%s910_s5] ss:$0 sm:$0xff]  ;;  %s402_s5 = sshll.u32 %s700_s4, 4  ;;  %p618_p4 = scmp.ne.s32.totalorder %s391_s20, %s617_s25  ;;  %s847_s5 = int_to_ptr.vmem [resolvable:$true] %s402_s5 }
  0x4f   :  { %498 = vmatprep.subr.bf16.mxu1 %v527_v6  ;;  %v455_v32 = vld [vmem:[%s911_s6] ss:$0 sm:$0xff]  ;;  %p622_p5 = scmp.lt.s32.totalorder %s391_s20, %s391_s20  ;;  %p623_p6 = scmp.lt.s32.totalorder %s617_s25, %s617_s25 }
  0x50   :  { %491 = vmatpush3.bf16.msra.mxu0 %v522_v1 }
  0x51   :  { %504 = vmatprep.subr.bf16.mxu0 %v526_v5  ;;  %499 = vmatpush3.bf16.msra.mxu1 %v527_v6  ;;  %p624_p7 = por %p623_p6, %p622_p5 }
  0x53   :  { %493 = vmatmul.mubr.msk.bf16.vlgmr.msra.gmra.mrb[0].mxu0 %vm124_vm0, %v525_v4  ;;  %p625_p8 = pnand %p624_p7, %p618_p4 }
  0x54   :  { %505 = vmatpush3.bf16.msra.mxu0 %v526_v5  ;;  %508 = vmatprep.mubr.msk.bf16.mxu0 %vm124_vm0, %v524_v3 }
  0x55   :  { %506 = vmatprep.subr.bf16.mxu0 %v528_v7  ;;  %501 = vmatmul.mubr.msk.bf16.vlgmr.msra.gmra.mrb[0].mxu1 %vm124_vm0, %v525_v4 }
  0x58   :  { %507 = vmatpush3.bf16.msra.mxu0 %v528_v7 }
  0x5b   :  { %509 = vmatmul.mubr.msk.bf16.vlgmr.msra.gmra.mrb[4].mxu0 %vm124_vm0, %v525_v4 }
 0x126   :  { %v494_v9 = vpop.f32.mrb[0].mxu0 }
 0x127   :  { %v174_v11 = vadd.f32 %v494_v9, %v435_v8  ;;  %v165_v12 = vpop.f32.mrb[1].mxu0 }
 0x128   :  { %v166_v13 = vadd.f32 %v435_v8, %v165_v12  ;;  %v495_v14 = vpop.f32.mrb[2].mxu0  ;;  %v502_v15 = vpop.f32.mrb[0].mxu1 }
 0x129   :  { %v466_v16 = vpack.c.bf16 %v174_v11, %v174_v11  ;;  %v177_v17 = vadd.f32 %v495_v14, %v435_v8  ;;  %v168_v18 = vpop.f32.mrb[3].mxu0  ;;  %v267_v19 = vadd.f32 %v502_v15, %v446_v10  ;;  %v258_v20 = vpop.f32.mrb[1].mxu1 }
 0x12a   :  { %v464_v21 = vpack.c.bf16 %v166_v13, %v166_v13  ;;  %v169_v22 = vadd.f32 %v435_v8, %v168_v18  ;;  %v259_v23 = vadd.f32 %v446_v10, %v258_v20  ;;  %v503_v24 = vpop.f32.mrb[2].mxu1 }
 0x12b   :  { %199 = vst.msk [vmem:[#allocation10 + $0x8] sm:$0xf] %vm196_vm1, %v466_v16  ;;  %v467_v25 = vpack.c.bf16 %v177_v17, %v177_v17  ;;  %v470_v26 = vpack.c.bf16 %v267_v19, %v267_v19  ;;  %v270_v27 = vadd.f32 %v503_v24, %v446_v10  ;;  %v261_v28 = vpop.f32.mrb[3].mxu1 }
 0x12c   :  { %197 = vst.msk [vmem:[#allocation10] sm:$0xf] %vm196_vm1, %v464_v21  ;;  %v465_v29 = vpack.c.bf16 %v169_v22, %v169_v22  ;;  %v468_v30 = vpack.c.bf16 %v259_v23, %v259_v23  ;;  %v262_v31 = vadd.f32 %v446_v10, %v261_v28 }
 0x12d   :  { %200 = vst.msk [vmem:[#allocation10 + $0xc] sm:$0xf] %vm196_vm1, %v467_v25  ;;  %291 = vst.msk [vmem:[#allocation11 + $0x8] sm:$0xf] %vm196_vm1, %v470_v26  ;;  %v471_v33 = vpack.c.bf16 %v270_v27, %v270_v27 }
 0x12e   :  { %198 = vst.msk [vmem:[#allocation10 + $0x4] sm:$0xf] %vm196_vm1, %v465_v29  ;;  %289 = vst.msk [vmem:[#allocation11] sm:$0xf] %vm196_vm1, %v468_v30  ;;  %v469_v34 = vpack.c.bf16 %v262_v31, %v262_v31  ;;  %v510_v35 = vpop.f32.mrb[4].mxu0 }
 0x12f   :  { %292 = vst.msk [vmem:[#allocation11 + $0xc] sm:$0xf] %vm196_vm1, %v471_v33  ;;  %v359_v36 = vadd.f32 %v510_v35, %v455_v32  ;;  %v350_v37 = vpop.f32.mrb[5].mxu0 }
 0x130   :  { %628 = shalt.err (!%p625_p8)
}
 0x131   :  { %s629_s0 = scalar_lea.hbm %s912_s7, 256 }
 0x132   :  { %p630_p9 = scmp.ne.s32.totalorder %s912_s7, %s629_s0  ;;  %p633_p10 = scmp.lt.u32.totalorder %s629_s0, %s912_s7 }
 0x134   :  { %p635_p11 = pnand %p633_p10, %p630_p9 }
 0x136   :  { %638 = shalt.err (!%p635_p11)
}
 0x137   :  { %396 = dma.vmem_to_hbm [thread:$0]  %s391_s20, 256, %s912_s7, [#allocation4], %s695_s21, %s695_s21, %s696_s22   ;;  %290 = vst.msk [vmem:[#allocation11 + $0x4] sm:$0xf] %vm196_vm1, %v469_v34  ;;  %v351_v38 = vadd.f32 %v455_v32, %v350_v37  ;;  %v511_v39 = vpop.f32.mrb[6].mxu0  ;;  %v474_v40 = vpack.c.bf16 %v359_v36, %v359_v36 }
 0x138   :  { %s701_s13 = smov [#allocation13]   ;;  %v362_v41 = vadd.f32 %v511_v39, %v455_v32  ;;  %v353_v42 = vpop.f32.mrb[7].mxu0  ;;  %s639_s10 = scalar_lea.vmem %s847_s5, 256 }
 0x139   :  { %s414_s1 = sshll.u32 %s701_s13, 4  ;;  %p640_p12 = scmp.ne.s32.totalorder %s847_s5, %s639_s10  ;;  %s415_s1 = int_to_ptr.vmem [resolvable:$true] %s414_s1 }
 0x13a   :  { %p644_p13 = scmp.lt.s32.totalorder %s847_s5, %s847_s5  ;;  %p645_p0 = scmp.lt.s32.totalorder %s639_s10, %s639_s10 }
 0x13c   :  { %p646_p1 = por %p645_p0, %p644_p13 }
 0x13e   :  { %p647_p2 = pnand %p646_p1, %p640_p12 }
 0x140   :  { %650 = shalt.err (!%p647_p2)
}
 0x141   :  { %s651_s7 = scalar_lea.hbm %s913_s8, 256 }
 0x142   :  { %p652_p3 = scmp.ne.s32.totalorder %s913_s8, %s651_s7  ;;  %p655_p4 = scmp.lt.u32.totalorder %s651_s7, %s913_s8 }
 0x144   :  { %p657_p5 = pnand %p655_p4, %p652_p3 }
 0x146   :  { %660 = shalt.err (!%p657_p5)
}
 0x147   :  { %408 = dma.vmem_to_hbm [thread:$0]  %s847_s5, 256, %s913_s8, [#allocation12], %s695_s21, %s695_s21, %s696_s22   ;;  %v472_v43 = vpack.c.bf16 %v351_v38, %v351_v38  ;;  %v354_v44 = vadd.f32 %v455_v32, %v353_v42  ;;  %383 = vst.msk [vmem:[#allocation13 + $0x8] sm:$0xf] %vm196_vm1, %v474_v40  ;;  %v475_v45 = vpack.c.bf16 %v362_v41, %v362_v41 }
 0x148   :  { %s661_s20 = scalar_lea.vmem %s415_s1, 256  ;;  %p666_p7 = scmp.lt.s32.totalorder %s415_s1, %s415_s1 }
 0x149   :  { %381 = vst.msk [vmem:[#allocation13] sm:$0xf] %vm196_vm1, %v472_v43  ;;  %v473_v46 = vpack.c.bf16 %v354_v44, %v354_v44  ;;  %384 = vst.msk [vmem:[#allocation13 + $0xc] sm:$0xf] %vm196_vm1, %v475_v45  ;;  %p662_p6 = scmp.ne.s32.totalorder %s415_s1, %s661_s20  ;;  %p667_p8 = scmp.lt.s32.totalorder %s661_s20, %s661_s20 }
 0x14b   :  { %382 = vst.msk [vmem:[#allocation13 + $0x4] sm:$0xf] %vm196_vm1, %v473_v46  ;;  %p668_p9 = por %p667_p8, %p666_p7 }
 0x14d   :  { %p669_p10 = pnand %p668_p9, %p662_p6 }
 0x14f   :  { %672 = shalt.err (!%p669_p10)
}
 0x150   :  { %s673_s5 = scalar_lea.hbm %s914_s9, 256 }
 0x151   :  { %p674_p11 = scmp.ne.s32.totalorder %s914_s9, %s673_s5  ;;  %p677_p12 = scmp.lt.u32.totalorder %s673_s5, %s914_s9 }
 0x153   :  { %p679_p13 = pnand %p677_p12, %p674_p11 }
 0x155   :  { %682 = shalt.err (!%p679_p13)
}
 0x156   :  { %420 = dma.vmem_to_hbm [thread:$0]  %s415_s1, 256, %s914_s9, [#allocation12], %s695_s21, %s695_s21, %s696_s22  }
 0x157   :  { %689 = dma.done.wait [#allocation4], 256  }
 0x158   :  { %690 = vsyncadd [#allocation4], 4294967040 }
 0x159   :  { %691 = dma.done.wait [#allocation12], 512  }
 0x15a   :  { %692 = vsyncadd [#allocation12], 4294966784 }
 0x15b   :  { %430 = vsyncpa [#allocation3], 1 }
 0x15c   :  { %431 = vsyncpa [#allocation6], 1 }
 0x15d   :  { %432 = vsyncpa [#allocation9], 1 }
 0x15e   :  { %433 = vsyncpa [#allocation4], 1 }
 0x15f   :  { %434 = vsyncpa [#allocation12], 1 }

</bundles_post_ra>
